<compile_context>
chip_gen: v6e
topology: v6e:2x2x1
jax: 0.10.0
libtpu: 0.0.40
codegen_flags: <defaults>
</compile_context>

<pallas_src>
import functools
import math

import jax
import jax.numpy as jnp
from jax.experimental import pallas as pl
from jax.experimental.pallas import tpu as pltpu


# ---------------------------------------------------------------------------
# Kernel: per-pixel YCbCr -> RGB on a lane-dense (1, 3, TR, L) block (VPU only).
# ---------------------------------------------------------------------------
def _ycbcr_to_rgb_kernel(img_ref, out_ref, *, c_r, c_g_cr, c_g_cb, c_b):
    y = img_ref[0, 0, :, :]
    cb = img_ref[0, 1, :, :] - 0.5
    cr = img_ref[0, 2, :, :] - 0.5

    out_ref[0, 0, :, :] = y + c_r * cr
    out_ref[0, 1, :, :] = y - c_g_cr * cr - c_g_cb * cb
    out_ref[0, 2, :, :] = y + c_b * cb


def _coeffs(w):
    wr, wg, wb = (float(v) for v in w)
    return dict(
        c_r=2.0 - 2.0 * wr,
        c_g_cr=(wr / wg) * (2.0 - 2.0 * wr),
        c_g_cb=(wb / wg) * (2.0 - 2.0 * wb),
        c_b=2.0 - 2.0 * wb,
    )


def _ycbcr_to_rgb_jnp(image, w):
    # Fused XLA elementwise fallback (tiny / non-lane-alignable images).
    c = _coeffs(w)
    y = image[..., 0, :, :]
    cb = image[..., 1, :, :] - 0.5
    cr = image[..., 2, :, :] - 0.5
    r = y + c["c_r"] * cr
    g = y - c["c_g_cr"] * cr - c["c_g_cb"] * cb
    b = y + c["c_b"] * cb
    return jnp.stack([r, g, b], axis=-3)


def _pick_layout(P, itemsize):
    """Pick (L, R, TR): lane width, rows and row-tile for a flattened
    per-channel plane of P pixels.  Returns None if no lane-dense layout
    exists without padding (caller falls back to the jnp path)."""
    for L in (1024, 512, 256, 128):
        if P % L == 0:
            R = P // L
            break
    else:
        return None

    # ~4 MiB per input block (3 channels); with default double-buffered
    # in+out that's ~16 MiB resident -> fits v5e/v6e (128 MiB) and v7x (64 MiB).
    target_block_bytes = 4 * 1024 * 1024
    max_rows = max(1, target_block_bytes // (3 * L * itemsize))
    if R <= max_rows:
        return L, R, R  # single row tile; full-extent dims need no (8,128) alignment
    # Keep the sublane dim aligned (8 for f32, 16 for bf16, 32 for int8/fp8).
    align = 8 if itemsize >= 4 else (16 if itemsize == 2 else 32)
    TR = max(align, (max_rows // align) * align)
    return L, R, TR


def ycbcr_to_rgb(image: jax.Array, w=(0.299, 0.587, 0.114)) -> jax.Array:
    """Convert a YCbCr image (*, 3, H, W) in [0, 1] to RGB using a Pallas kernel."""
    if image.ndim < 3 or image.shape[-3] != 3:
        raise ValueError(f"Input size must have a shape of (*, 3, H, W). Got {image.shape}")

    *lead, C, H, W = image.shape
    P = H * W
    itemsize = jnp.dtype(image.dtype).itemsize

    layout = _pick_layout(P, itemsize)
    if layout is None:
        # H*W not a multiple of 128: the lane-dense reshape would require a
        # padding copy that costs more HBM traffic than the op itself.
        return _ycbcr_to_rgb_jnp(image, w)

    L, R, TR = layout
    B = int(math.prod(lead)) if lead else 1

    # Row-major linearization is unchanged -> these reshapes are free (no copy).
    x = image.reshape(B, 3, R, L)

    kernel = functools.partial(_ycbcr_to_rgb_kernel, **_coeffs(w))
    n_row_tiles = pl.cdiv(R, TR)
    block_bytes = 3 * TR * L * itemsize
    resident_bytes = 4 * block_bytes  # 2 buffers x (in block + out block)

    out = pl.pallas_call(
        kernel,
        out_shape=jax.ShapeDtypeStruct((B, 3, R, L), image.dtype),
        grid_spec=pltpu.PrefetchScalarGridSpec(
            num_scalar_prefetch=0,
            grid=(B, n_row_tiles),
            in_specs=[pl.BlockSpec((1, 3, TR, L), lambda b, r: (b, 0, r, 0))],
            out_specs=pl.BlockSpec((1, 3, TR, L), lambda b, r: (b, 0, r, 0)),
        ),
        compiler_params=pltpu.CompilerParams(
            dimension_semantics=("parallel", "parallel"),
            vmem_limit_bytes=int(max(32 * 1024 * 1024, resident_bytes + (2 << 20))),
        ),
        cost_estimate=pl.CostEstimate(
            flops=10 * B * P,
            transcendentals=0,
            bytes_accessed=2 * 3 * B * P * itemsize,
        ),
    )(x)

    return out.reshape(*lead, C, H, W)


class YcbcrToRgb:
    """JAX/Pallas equivalent of the PyTorch YcbcrToRgb module."""

    def __init__(self, w):
        self.w = w

    def __call__(self, image: jax.Array) -> jax.Array:
        return ycbcr_to_rgb(image, self.w)


def _reference(image, w):
    # Direct (un-folded) formula, mirrors the PyTorch module.
    wr, wg, wb = w
    y = image[..., 0, :, :]
    cb = image[..., 1, :, :] - 0.5
    cr = image[..., 2, :, :] - 0.5
    r = y + (2 - 2 * wr) * cr
    g = y - wr / wg * (2 - 2 * wr) * cr - wb / wg * (2 - 2 * wb) * cb
    b = y + (2 - 2 * wb) * cb
    return jnp.stack([r, g, b], axis=-3)


if __name__ == "__main__":
    w_human = (0.299, 0.587, 0.114)
    module = YcbcrToRgb(w_human)

    # Primary test: (B, 3, H, W); H*W = 256 -> Pallas path (lane width 256).
    x = jax.random.uniform(jax.random.PRNGKey(0), (2, 3, 16, 16), dtype=jnp.float32)
    out = jax.block_until_ready(module(x))
    assert out.shape == x.shape
    assert jnp.allclose(out, _reference(x, w_human), atol=1e-5, rtol=1e-5)

    # Extra leading dims, different spatial size; still the Pallas path.
    x2 = jax.random.uniform(jax.random.PRNGKey(1), (2, 2, 3, 8, 32), dtype=jnp.float32)
    out2 = jax.block_until_ready(module(x2))
    assert out2.shape == x2.shape
    assert jnp.allclose(out2, _reference(x2, w_human), atol=1e-5, rtol=1e-5)

    print("KERNEL_OK")
</pallas_src>

<mosaic_0001>
module attributes {stable_mosaic.version = 11 : i64} {
  func.func @_ycbcr_to_rgb_kernel(%arg0: i32, %arg1: i32, %arg2: memref<1x3x1x256xf32, #tpu.memory_space<vmem>>, %arg3: memref<1x3x1x256xf32, #tpu.memory_space<vmem>>) attributes {dimension_semantics = [#tpu.dimension_semantics<parallel>, #tpu.dimension_semantics<parallel>], iteration_bounds = array<i64: 2, 1>, scalar_prefetch = 0 : i64, scratch_operands = 0 : i64, tpu.core_type = #tpu.core_type<tc>, window_params = [{transform_indices = @transform_0, window_bounds = array<i64: 1, 3, 1, 256>}, {transform_indices = @transform_1, window_bounds = array<i64: 1, 3, 1, 256>}]} {
    %c0 = arith.constant 0 : index
    %c0_0 = arith.constant 0 : index
    %c0_1 = arith.constant 0 : index
    %c0_2 = arith.constant 0 : index
    %0 = vector.load %arg2[%c0, %c0_0, %c0_1, %c0_2] : memref<1x3x1x256xf32, #tpu.memory_space<vmem>>, vector<1x1x1x256xf32>
    %1 = vector.shape_cast %0 : vector<1x1x1x256xf32> to vector<1x256xf32>
    %c0_3 = arith.constant 0 : index
    %c1 = arith.constant 1 : index
    %c0_4 = arith.constant 0 : index
    %c0_5 = arith.constant 0 : index
    %2 = vector.load %arg2[%c0_3, %c1, %c0_4, %c0_5] : memref<1x3x1x256xf32, #tpu.memory_space<vmem>>, vector<1x1x1x256xf32>
    %3 = vector.shape_cast %2 : vector<1x1x1x256xf32> to vector<1x256xf32>
    %cst = arith.constant 5.000000e-01 : f32
    %4 = vector.broadcast %cst : f32 to vector<1x256xf32>
    %5 = arith.subf %3, %4 : vector<1x256xf32>
    %c0_6 = arith.constant 0 : index
    %c2 = arith.constant 2 : index
    %c0_7 = arith.constant 0 : index
    %c0_8 = arith.constant 0 : index
    %6 = vector.load %arg2[%c0_6, %c2, %c0_7, %c0_8] : memref<1x3x1x256xf32, #tpu.memory_space<vmem>>, vector<1x1x1x256xf32>
    %7 = vector.shape_cast %6 : vector<1x1x1x256xf32> to vector<1x256xf32>
    %cst_9 = arith.constant 5.000000e-01 : f32
    %8 = vector.broadcast %cst_9 : f32 to vector<1x256xf32>
    %9 = arith.subf %7, %8 : vector<1x256xf32>
    %cst_10 = arith.constant 1.402000e+00 : f32
    %10 = vector.broadcast %cst_10 : f32 to vector<1x256xf32>
    %11 = arith.mulf %10, %9 : vector<1x256xf32>
    %12 = arith.addf %1, %11 : vector<1x256xf32>
    %c0_11 = arith.constant 0 : index
    %c0_12 = arith.constant 0 : index
    %c0_13 = arith.constant 0 : index
    %c0_14 = arith.constant 0 : index
    %13 = vector.load %arg3[%c0_11, %c0_12, %c0_13, %c0_14] : memref<1x3x1x256xf32, #tpu.memory_space<vmem>>, vector<1x1x1x256xf32>
    %14 = vector.shape_cast %13 : vector<1x1x1x256xf32> to vector<1x256xf32>
    %15 = vector.shape_cast %12 : vector<1x256xf32> to vector<1x1x1x256xf32>
    tpu.vector_store %arg3[%c0_11, %c0_12, %c0_13, %c0_14], %15 {strides = array<i32>} : memref<1x3x1x256xf32, #tpu.memory_space<vmem>>, vector<1x1x1x256xf32>,
    %cst_15 = arith.constant 0.714136302 : f32
    %16 = vector.broadcast %cst_15 : f32 to vector<1x256xf32>
    %17 = arith.mulf %16, %9 : vector<1x256xf32>
    %18 = arith.subf %1, %17 : vector<1x256xf32>
    %cst_16 = arith.constant 0.344136298 : f32
    %19 = vector.broadcast %cst_16 : f32 to vector<1x256xf32>
    %20 = arith.mulf %19, %5 : vector<1x256xf32>
    %21 = arith.subf %18, %20 : vector<1x256xf32>
    %c0_17 = arith.constant 0 : index
    %c1_18 = arith.constant 1 : index
    %c0_19 = arith.constant 0 : index
    %c0_20 = arith.constant 0 : index
    %22 = vector.load %arg3[%c0_17, %c1_18, %c0_19, %c0_20] : memref<1x3x1x256xf32, #tpu.memory_space<vmem>>, vector<1x1x1x256xf32>
    %23 = vector.shape_cast %22 : vector<1x1x1x256xf32> to vector<1x256xf32>
    %24 = vector.shape_cast %21 : vector<1x256xf32> to vector<1x1x1x256xf32>
    tpu.vector_store %arg3[%c0_17, %c1_18, %c0_19, %c0_20], %24 {strides = array<i32>} : memref<1x3x1x256xf32, #tpu.memory_space<vmem>>, vector<1x1x1x256xf32>,
    %cst_21 = arith.constant 1.772000e+00 : f32
    %25 = vector.broadcast %cst_21 : f32 to vector<1x256xf32>
    %26 = arith.mulf %25, %5 : vector<1x256xf32>
    %27 = arith.addf %1, %26 : vector<1x256xf32>
    %c0_22 = arith.constant 0 : index
    %c2_23 = arith.constant 2 : index
    %c0_24 = arith.constant 0 : index
    %c0_25 = arith.constant 0 : index
    %28 = vector.load %arg3[%c0_22, %c2_23, %c0_24, %c0_25] : memref<1x3x1x256xf32, #tpu.memory_space<vmem>>, vector<1x1x1x256xf32>
    %29 = vector.shape_cast %28 : vector<1x1x1x256xf32> to vector<1x256xf32>
    %30 = vector.shape_cast %27 : vector<1x256xf32> to vector<1x1x1x256xf32>
    tpu.vector_store %arg3[%c0_22, %c2_23, %c0_24, %c0_25], %30 {strides = array<i32>} : memref<1x3x1x256xf32, #tpu.memory_space<vmem>>, vector<1x1x1x256xf32>,
    return
  }
  func.func @transform_0(%arg0: i32, %arg1: i32) -> (i32, i32, i32, i32) {
    %c0_i32 = arith.constant 0 : i32
    %c0_i32_0 = arith.constant 0 : i32
    %c0_i32_1 = arith.constant 0 : i32
    return %arg0, %c0_i32, %arg1, %c0_i32_0 : i32, i32, i32, i32
  }
  func.func @transform_1(%arg0: i32, %arg1: i32) -> (i32, i32, i32, i32) {
    %c0_i32 = arith.constant 0 : i32
    %c0_i32_0 = arith.constant 0 : i32
    %c0_i32_1 = arith.constant 0 : i32
    return %arg0, %c0_i32, %arg1, %c0_i32_0 : i32, i32, i32, i32
  }
}

</mosaic_0001>

<bundles_post_ra>
// kernel: tpu_custom_call.1
= control target key start
LH: loop header
LB: loop body
LE: loop exit
PB: predicated region body
PF: predicated region fallthrough
CT: control target
= control target key end

     0   :  { %6 = vsyncpa [#allocation3], 0  ;;  %s637_s0 = inlined_call_operand.hbm [shape: f32[2,3,1,256], index: 0, kind: input, shape index: {}]   ;;  %s638_s1 = inlined_call_operand.hbm [shape: f32[2,3,1,256], index: 1, kind: output, shape index: {}]  }
   0x1   :  { %8 = vsyncpa [#allocation3 + $0x1], 0 }
   0x2   :  { %9 = vsyncpa [#allocation4], 0 }
   0x3   :  { %11 = vsyncpa [#allocation4 + $0x1], 0  ;;  %s491_s6 = smov 0   ;;  %s493_s7 = smov 0  }
   0x4   :  { %s495_s8 = smov 0   ;;  %s497_s9 = smov 0  }
   0x5   :  { %s499_s10 = smov 0   ;;  %s501_s11 = smov 0  }
   0x6 LB: > { %s280_s12 = sadd.s32 4294967295, %s473_s11   ;;  %s281_s13 = sadd.s32 4294967294, %s473_s11   ;;  %s473_s11 = sphi %s501_s11, %s17_s11   ;;  %s469_s10 = sphi %s499_s10, %s649_s10   ;;  %s465_s9 = sphi %s497_s9, %s648_s9   ;;  %s461_s8 = sphi %s495_s8, %s647_s8   ;;  %s457_s7 = sphi %s493_s7, %s646_s7   ;;  %s453_s6 = sphi %s491_s6, %s645_s6  }
   0x7   : > { %s29_s14 = sadd.s32 1, %s469_s10  ;;  %s38_s15 = sadd.s32 1, %s461_s8 }
   0x8   : > { %p31_p0 = scmp.ge.s32.totalorder %s29_s14, 2  ;;  %p45_p1 = scmp.ne.s32.totalorder %s461_s8, %s457_s7 }
   0x9   : > { %p46_p2 = scmp.eq.s32.totalorder %s473_s11, 0  ;;  %p51_p3 = scmp.ne.s32.totalorder %s457_s7, %s453_s6 }
   0xa   : > { %s651_s14 = smov (%p31_p0, %s29_s14), 0  ;;  %p52_p5 = scmp.eq.s32.totalorder %s280_s12, 0 }
   0xb   : > { %p532_p4 = por %p46_p2, %p45_p1  ;;  %s33_s17 = ssub.s32 %s469_s10, %s651_s14 }
   0xc   : > { %p77_p6 = scmp.eq.s32.totalorder %s280_s12, 1  ;;  %p36_p7 = scmp.eq.s32.totalorder %s33_s17, 0 }
   0xd   : > { %p538_p8 = por %p52_p5, %p51_p3  ;;  %p83_p10 = scmp.eq.s32.totalorder %s281_s13, 1 }
   0xe   : > { %p542_p9 = por %p77_p6, %p45_p1  ;;  %p311_p13 = scmp.lt.s32.totalorder %s473_s11, 2 }
   0xf   : > { %s547_s20 = scalar_select %p36_p7, %s461_s8, %s38_s15  }
  0x10   : > { %p549_p11 = por %p83_p10, %p51_p3  ;;  %s103_s22 = sand.u32 1, %s461_s8  }
  0x11   : > { %s295_s23 = smul.u32 6, %s103_s22  ;;  %p559_p0 = pnand %p311_p13, %p532_p4 }
  0x12   : > { %s296_s24 = smul.u32 96, %s469_s10  ;;  %p285_p1 = scmp.ge.s32.totalorder %s473_s11, 1 }
  0x13   : > { %s107_s29 = scalar_lea.vmem [#allocation2], %s295_s23  ;;  %s104_s2 = scalar_lea.sflag [#allocation3], %s103_s22 }
  0x14   : > { %s115_s28 = scalar_lea.hbm %s637_s0, %s296_s24  ;;  %s116_s30 = sshll.u32 %s107_s29, 4  ;;  %s117_s30 = int_to_ptr.vmem [resolvable:$true] %s116_s30 }
  0x15   : > { %p367_p2 = pneg %p559_p0  ;;  %s378_s3 = scalar_lea.vmem %s117_s30, 96 }
  0x16   : > { %p379_p3 = scmp.ne.s32.totalorder %s117_s30, %s378_s3  ;;  %s475_s4 = smov [#allocation2]  }
  0x17   : > { %s383_s5 = sshll.u32 %s475_s4, 4  ;;  %s384_s5 = int_to_ptr.vmem [resolvable:$false] %s383_s5 }
  0x18   : > { %p381_p5 = pnand %p379_p3, %p367_p2  ;;  %s385_s12 = scalar_lea.vmem %s384_s5, 192 }
  0x19   : > { %p386_p4 = scmp.lt.s32.totalorder %s117_s30, %s384_s5  ;;  %p387_p7 = scmp.lt.s32.totalorder %s385_s12, %s378_s3 }
  0x1a   : > { %p382_p6 = pneg %p381_p5 }
  0x1b   : > { %p388_p10 = por %p387_p7, %p386_p4 }
  0x1d   : > { %p389_p13 = pnand %p388_p10, %p382_p6 }
  0x1f   : > { %392 = shalt.err (!%p389_p13)
}
  0x20   : > { %s476_s13 = smov 32   ;;  %s477_s15 = smov 2  }
  0x21   : > { %306 = dma.hbm_to_vmem [thread:$0]  (!%p559_p0), %s115_s28, 96, %s117_s30, %s104_s2, %s476_s13, %s476_s13, %s477_s15  }
  0x22   : > { %p124_p12 = scmp.lt.s32.totalorder %s473_s11, 3 }
  0x24   : > { %p125_p2 = pnand %p285_p1, %p124_p12 }
  0x25   : > { %s575_s16 = sand.u32 (!%p125_p2), 1, %s457_s7  }
  0x26   : > { %128 = sbr.rel (%p125_p2) target bundleno = 70 (0x46), region = 24  ;;  %s131_s22 = scalar_lea.sflag (!%p125_p2), [#allocation3], %s575_s16 }
  0x27   : > { %s297_s17 = smul.u32 (!%p125_p2), 6, %s575_s16 }
  0x29   : > { %s134_s23 = scalar_lea.vmem (!%p125_p2), [#allocation2], %s297_s17 }
  0x2b   : > { %444 = dma.done.wait (%p538_p8), %s131_s22, 96  }
  0x2c   : > { %446 = vsyncadd (%p538_p8), %s131_s22, 4294967200  ;;  %v288_v0 = vld [vmem:[%s134_s23 + $0x4] sm:$0x3]  ;;  %v162_v1 = vlaneseq  ;;  %v286_v2 = vld [vmem:[%s134_s23 + $0x2] sm:$0x3]  ;;  %s152_s24 = scalar_lea.vmem [#allocation5], %s297_s17 }
  0x2d   : > { %v289_v3 = vadd.f32 -0.5, %v288_v0  ;;  %v287_v4 = vadd.f32 -0.5, %v286_v2  ;;  %v153_v5 = vld [vmem:[%s134_s23] sm:$0x3]  ;;  %s193_s25 = sshll.u32 %s152_s24, 4  ;;  %s298_s26 = smul.u32 96, %s465_s9  ;;  %s584_s25 = int_to_ptr.vmem [resolvable:$true] %s193_s25 }
  0x2e   : > { %vm164_vm0 = vcmp.lt.s32.totalorder %v162_v1, 256  ;;  %s178_s28 = scalar_lea.sflag [#allocation4], %s575_s16  ;;  %s393_s29 = scalar_lea.vmem %s584_s25, 96 }
  0x2f   : > { %v160_v6 = vmul.f32 1.402, %v289_v3  ;;  %v167_v7 = vmul.f32 0.7141363, %v289_v3  ;;  %v169_v8 = vmul.f32 0.3441363, %v287_v4  ;;  %s589_s9 = scalar_lea.hbm %s638_s1, %s298_s26  ;;  %p394_p8 = scmp.ne.s32.totalorder %s584_s25, %s393_s29 }
  0x30   : > { %v173_v9 = vmul.f32 1.772, %v287_v4  ;;  %s478_s30 = smov [#allocation5]  }
  0x31   : > { %v161_v10 = vadd.f32 %v160_v6, %v153_v5  ;;  %v168_v11 = vsub.f32 %v153_v5, %v167_v7  ;;  %p395_p12 = pnand %p394_p8, %p542_p9  ;;  %s397_s2 = sshll.u32 %s478_s30, 4  ;;  %s398_s2 = int_to_ptr.vmem [resolvable:$false] %s397_s2 }
  0x32   : > { %v174_v12 = vadd.f32 %v173_v9, %v153_v5  ;;  %s399_s3 = scalar_lea.vmem %s398_s2, 192  ;;  %p400_p1 = scmp.lt.s32.totalorder %s584_s25, %s398_s2 }
  0x33   : > { %166 = vst.msk [vmem:[%s152_s24] sm:$0x3] %vm164_vm0, %v161_v10  ;;  %v170_v13 = vsub.f32 %v168_v11, %v169_v8  ;;  %p396_p0 = pneg %p395_p12  ;;  %p401_p3 = scmp.lt.s32.totalorder %s399_s3, %s393_s29 }
  0x34   : > { %291 = vst.msk [vmem:[%s152_s24 + $0x4] sm:$0x3] %vm164_vm0, %v174_v12 }
  0x35   : > { %290 = vst.msk [vmem:[%s152_s24 + $0x2] sm:$0x3] %vm164_vm0, %v170_v13  ;;  %p402_p5 = por %p401_p3, %p400_p1 }
  0x37   : > { %p403_p6 = pnand %p402_p5, %p396_p0 }
  0x39   : > { %406 = shalt.err (!%p403_p6)
}
  0x3a   : > { %s407_s4 = scalar_lea.hbm %s589_s9, 96  ;;  %s411_s13 = scalar_lea.hbm %s638_s1, 192 }
  0x3b   : > { %p408_p4 = scmp.ne.s32.totalorder %s589_s9, %s407_s4  ;;  %p412_p13 = scmp.lt.s32.totalorder %s589_s9, %s638_s1 }
  0x3c   : > { %p413_p2 = scmp.lt.s32.totalorder %s411_s13, %s407_s4 }
  0x3d   : > { %p409_p7 = pnand %p408_p4, %p542_p9 }
  0x3e   : > { %p414_p8 = por %p413_p2, %p412_p13 }
  0x3f   : > { %p410_p10 = pneg %p409_p7 }
  0x41   : > { %p415_p12 = pnand %p414_p8, %p410_p10 }
  0x43   : > { %418 = shalt.err (!%p415_p12)
}
  0x44   : > { %s479_s22 = smov 32   ;;  %s480_s23 = smov 2  }
  0x45   : > { %301 = dma.vmem_to_hbm [thread:$0]  (%p542_p9), %s584_s25, 96, %s589_s9, %s178_s28, %s479_s22, %s479_s22, %s480_s23  }
  0x46 PF: > { %s208_s24 = sand.u32 1, %s453_s6   ;;  %p644_p0 = scmp.ge.s32.totalorder %s473_s11, 2 }
  0x47   : > { %s209_s26 = scalar_lea.sflag [#allocation4], %s208_s24 }
  0x48   : > { %p308_p1 = pnand %p644_p0, %p549_p11 }
  0x4a   : > { %p309_p3 = pneg %p308_p1 }
  0x4c   : > { %448 = dma.done.wait (%p309_p3), %s209_s26, 96  }
  0x4d   : > { %450 = vsyncadd (%p309_p3), %s209_s26, 4294967200  ;;  %s17_s11 = sadd.s32 1, %s473_s11   ;;  %s645_s6 = smov %s457_s7 }
  0x4e   : > { %p14_p5 = scmp.ge.s32.totalorder %s17_s11, 4   ;;  %s646_s7 = smov %s461_s8 }
  0x4f   : > { %s647_s8 = smov %s547_s20  ;;  %s648_s9 = smov %s469_s10 }
  0x50   : > { %s649_s10 = smov %s651_s14  ;;  %16 = sbr.rel (!%p14_p5) target bundleno = 6 (0x6), region = 73 }
  0x55   :  { %214 = vsyncpa [#allocation3], 1 }
  0x56   :  { %216 = vsyncpa [#allocation3 + $0x1], 1 }
  0x57   :  { %217 = vsyncpa [#allocation4], 1 }
  0x58   :  { %219 = vsyncpa [#allocation4 + $0x1], 1 }

</bundles_post_ra>
